<compile_context>
chip_gen: v7x
topology: tpu7x:2x2x1
jax: 0.10.0
libtpu: 0.0.40
codegen_flags: <defaults>
</compile_context>

<pallas_src>
import functools

import jax
import jax.numpy as jnp
from jax.experimental import pallas as pl
from jax.experimental.pallas import tpu as pltpu


def _gated_conv_kernel(x_ref, w_ref, b_ref, out_ref, *, matmul_dtype):
    """One grid step == one independent (time-tile, batch) slab; full block chain here.

    x_ref  : (C_in, T_tile)  input dtype   activation slab (channels on sublanes)
    w_ref  : (num_blocks, 2*C_out, C_in)   fused out|gate weights, matmul dtype (resident)
    b_ref  : (num_blocks, 2*C_out, 1) f32  fused out|gate biases (resident)
    out_ref: (C_out, T_tile) f32           skip-connection sum for this slab
    """
    num_blocks = w_ref.shape[0]
    c_out = w_ref.shape[1] // 2

    def glu_block(i, x_f32):
        # One fused (2*C_out, C_in) @ (C_in, T_tile) MXU matmul per block, f32 accumulate.
        h = jnp.dot(w_ref[i], x_f32.astype(matmul_dtype),
                    preferred_element_type=jnp.float32) + b_ref[i]
        return h[:c_out, :] * jax.nn.sigmoid(h[c_out:, :])

    x = x_ref[...].astype(jnp.float32)   # cast (if any) happens in-kernel, not in HBM

    # Peel block 0: avoids a zeros skip-accumulator materialization + one add/store.
    y = glu_block(0, x)
    x, skip = y, y

    if num_blocks <= 8:
        # Small block counts: static unroll, weights are tiny and VMEM-resident.
        for i in range(1, num_blocks):
            y = glu_block(i, x)
            skip = skip + y
            x = y
    else:
        # Many blocks: fori_loop bounds live ranges / code size (dynamic w_ref[i] is fine).
        def body(i, carry):
            xc, sk = carry
            yc = glu_block(i, xc)
            return yc, sk + yc
        x, skip = jax.lax.fori_loop(1, num_blocks, body, (x, skip))

    out_ref[...] = skip.astype(out_ref.dtype)


def _round_up(x, m):
    return ((x + m - 1) // m) * m


def _pick_t_tile(t_128):
    """Largest lane-dense tile (multiple of 128) with bounded padding waste (<= T/8)."""
    for cand in (4096, 2048, 1024, 512, 256, 128):
        if cand > t_128:
            continue
        pad = (-t_128) % cand
        if pad == 0 or pad * 8 <= t_128:
            return cand
    return 128


def gated_conv_net(x_nct, w_out, b_out, w_gate, b_gate, *,
                   t_tile=None, matmul_dtype=jnp.bfloat16):
    """
    x_nct  : (B, C_in, T)  activations (PyTorch NCT convention, streamed as-is)
    w_out  : (num_blocks, C_out, C_in)   Conv1d(k=1) weights, out-conv
    b_out  : (num_blocks, C_out)         out-conv bias
    w_gate : (num_blocks, C_out, C_in)   gate-conv weights
    b_gate : (num_blocks, C_out)         gate-conv bias
    returns: (B, C_out, T) float32 == sum of per-block skip connections
    """
    B, C_in, T = x_nct.shape
    num_blocks, C_out, C_in_w = w_out.shape
    assert C_in_w == C_in
    assert C_in == C_out, "chaining GLU1d blocks requires in_channels == out_channels"

    if t_tile is None:
        t_tile = _pick_t_tile(_round_up(T, 128))
    assert t_tile % 128 == 0, "time tile must be lane-dense (multiple of 128)"

    # Pad the time axis so every tile is a full lane-dense (C, t_tile) slab; the 1x1
    # convs are pointwise in time, so padded columns are simply sliced off at the end.
    T_pad = _round_up(T, t_tile)
    if T_pad != T:
        x_nct = jnp.pad(x_nct, ((0, 0), (0, 0), (0, T_pad - T)))

    # Fuse out|gate into a single GEMM per block; weights go to the matmul dtype once.
    w_fused = jnp.concatenate([w_out, w_gate], axis=1).astype(matmul_dtype)            # (nb, 2*C_out, C_in)
    b_fused = jnp.concatenate([b_out, b_gate], axis=1).astype(jnp.float32)[..., None]  # (nb, 2*C_out, 1)

    num_t = T_pad // t_tile
    grid = (num_t, B)   # larger extent leads -> better megacore balance on v7x

    in_itemsize = jnp.dtype(x_nct.dtype).itemsize
    w_bytes = int(w_fused.size) * jnp.dtype(matmul_dtype).itemsize + int(b_fused.size) * 4
    cost = pl.CostEstimate(
        flops=2 * num_blocks * (2 * C_out) * C_in * B * T_pad,
        transcendentals=num_blocks * C_out * B * T_pad,
        bytes_accessed=B * T_pad * (C_in * in_itemsize + C_out * 4) + w_bytes,
    )

    # Explicit VMEM budget (v7x: 64 MiB physical / 32 MiB default scoped):
    # double-buffered in/out tiles + block-chain temporaries + resident weights.
    per_step = (2 * C_in * t_tile * in_itemsize      # input double-buffer
                + 2 * C_out * t_tile * 4             # output double-buffer
                + 6 * C_out * t_tile * 4)            # h / y / skip temporaries (generous)
    vmem_limit = int(min(64 << 20, max(32 << 20, 2 * (per_step + 2 * w_bytes))))

    kernel = functools.partial(_gated_conv_kernel, matmul_dtype=matmul_dtype)

    out = pl.pallas_call(
        kernel,
        out_shape=jax.ShapeDtypeStruct((B, C_out, T_pad), jnp.float32),
        grid_spec=pltpu.PrefetchScalarGridSpec(
            num_scalar_prefetch=0,
            grid=grid,
            in_specs=[
                # Activation slab: squeeze batch, channels on sublanes, time on lanes.
                # (If xprof shows exposed DMA on v5e, add pipeline_mode=pl.Buffered(3).)
                pl.BlockSpec((None, C_in, t_tile), lambda t, b: (b, 0, t)),
                # Fused weights / biases: tiny, resident across all grid steps.
                pl.BlockSpec((num_blocks, 2 * C_out, C_in), lambda t, b: (0, 0, 0)),
                pl.BlockSpec((num_blocks, 2 * C_out, 1), lambda t, b: (0, 0, 0)),
            ],
            out_specs=pl.BlockSpec((None, C_out, t_tile), lambda t, b: (b, 0, t)),
        ),
        compiler_params=pltpu.CompilerParams(
            dimension_semantics=("parallel", "parallel"),
            vmem_limit_bytes=vmem_limit),
        cost_estimate=cost,
    )(x_nct, w_fused, b_fused)

    if T_pad != T:
        out = out[:, :, :T]
    return out


def _reference(x_nct, w_out, b_out, w_gate, b_gate):
    """Pure-JAX reference mirroring the PyTorch forward (NCT layout throughout)."""
    x = x_nct.astype(jnp.float32)
    B, _, T = x.shape
    skip = jnp.zeros((B, w_out.shape[1], T), jnp.float32)
    hp = jax.lax.Precision.HIGHEST
    for i in range(w_out.shape[0]):
        a = jnp.einsum("oc,bct->bot", w_out[i], x, precision=hp) + b_out[i][None, :, None]
        g = jnp.einsum("oc,bct->bot", w_gate[i], x, precision=hp) + b_gate[i][None, :, None]
        y = a * jax.nn.sigmoid(g)
        skip = skip + y
        x = y
    return skip


if __name__ == "__main__":
    # Small, deterministic shapes consistent with the module.
    B, C, num_blocks = 2, 32, 4          # in_channels == out_channels == 32

    key = jax.random.PRNGKey(0)
    k_x, k_wo, k_bo, k_wg, k_bg = jax.random.split(key, 5)

    scale = 1.0 / jnp.sqrt(jnp.float32(C))
    w_out = jax.random.normal(k_wo, (num_blocks, C, C), dtype=jnp.float32) * scale
    b_out = jax.random.normal(k_bo, (num_blocks, C), dtype=jnp.float32) * 0.1
    w_gate = jax.random.normal(k_wg, (num_blocks, C, C), dtype=jnp.float32) * scale
    b_gate = jax.random.normal(k_bg, (num_blocks, C), dtype=jnp.float32) * 0.1

    # Case 1: lane-aligned T, f32 MXU operands -> strict numerics check vs reference.
    T1 = 256
    x1 = jax.random.normal(k_x, (B, C, T1), dtype=jnp.float32)
    out1 = jax.block_until_ready(
        gated_conv_net(x1, w_out, b_out, w_gate, b_gate, matmul_dtype=jnp.float32))
    ref1 = _reference(x1, w_out, b_out, w_gate, b_gate)
    assert out1.shape == (B, C, T1)
    assert jnp.allclose(out1, ref1, atol=2e-4, rtol=2e-4), "f32 path mismatch vs reference"

    # Case 2: ragged T (exercises pad-to-lane-dense path), default bf16 MXU operands.
    T2 = 200
    x2 = jax.random.normal(k_x, (B, C, T2), dtype=jnp.float32)
    out2 = jax.block_until_ready(gated_conv_net(x2, w_out, b_out, w_gate, b_gate))
    ref2 = _reference(x2, w_out, b_out, w_gate, b_gate)
    assert out2.shape == (B, C, T2)
    assert jnp.allclose(out2, ref2, atol=5e-2, rtol=5e-2), "bf16 path mismatch vs reference"

    print("KERNEL_OK")
</pallas_src>

<mosaic_0001>
module attributes {stable_mosaic.version = 11 : i64} {
  func.func @_gated_conv_kernel(%arg0: i32, %arg1: i32, %arg2: memref<1x32x256xf32, #tpu.memory_space<vmem>>, %arg3: memref<4x64x32xf32, #tpu.memory_space<vmem>>, %arg4: memref<4x64x1xf32, #tpu.memory_space<vmem>>, %arg5: memref<1x32x256xf32, #tpu.memory_space<vmem>>) attributes {dimension_semantics = [#tpu.dimension_semantics<parallel>, #tpu.dimension_semantics<parallel>], iteration_bounds = array<i64: 1, 2>, scalar_prefetch = 0 : i64, scratch_operands = 0 : i64, tpu.core_type = #tpu.core_type<tc>, window_params = [{transform_indices = @transform_0, window_bounds = array<i64: 1, 32, 256>}, {pipeline_mode = #tpu.pipeline_mode<synchronous>, transform_indices = @transform_1, window_bounds = array<i64: 4, 64, 32>}, {pipeline_mode = #tpu.pipeline_mode<synchronous>, transform_indices = @transform_2, window_bounds = array<i64: 4, 64, 1>}, {transform_indices = @transform_3, window_bounds = array<i64: 1, 32, 256>}]} {
    %c0 = arith.constant 0 : index
    %c0_0 = arith.constant 0 : index
    %c0_1 = arith.constant 0 : index
    %0 = vector.load %arg2[%c0, %c0_0, %c0_1] : memref<1x32x256xf32, #tpu.memory_space<vmem>>, vector<1x32x256xf32>
    %1 = vector.shape_cast %0 : vector<1x32x256xf32> to vector<32x256xf32>
    %c0_2 = arith.constant 0 : index
    %c0_3 = arith.constant 0 : index
    %c0_4 = arith.constant 0 : index
    %2 = vector.load %arg3[%c0_2, %c0_3, %c0_4] : memref<4x64x32xf32, #tpu.memory_space<vmem>>, vector<1x64x32xf32>
    %3 = vector.shape_cast %2 : vector<1x64x32xf32> to vector<64x32xf32>
    %cst = arith.constant dense<0.000000e+00> : vector<64x256xf32>
    %4 = tpu.matmul %3, %1, %cst {dimension_numbers = #tpu.dot_dimension_numbers<[1], [0], [0], [1], [0, 0, 1, 1], [], []>} : vector<64x32xf32>, vector<32x256xf32>, vector<64x256xf32> -> vector<64x256xf32>
    %c0_5 = arith.constant 0 : index
    %c0_6 = arith.constant 0 : index
    %c0_7 = arith.constant 0 : index
    %5 = vector.load %arg4[%c0_5, %c0_6, %c0_7] : memref<4x64x1xf32, #tpu.memory_space<vmem>>, vector<1x64x1xf32>
    %6 = vector.shape_cast %5 : vector<1x64x1xf32> to vector<64x1xf32>
    %7 = vector.broadcast %6 : vector<64x1xf32> to vector<64x256xf32>
    %8 = arith.addf %4, %7 : vector<64x256xf32>
    %9 = vector.extract_strided_slice %8 {offsets = [0, 0], sizes = [32, 256], strides = [1, 1]} : vector<64x256xf32> to vector<32x256xf32>
    %10 = vector.extract_strided_slice %8 {offsets = [32, 0], sizes = [32, 256], strides = [1, 1]} : vector<64x256xf32> to vector<32x256xf32>
    %11 = arith.negf %10 : vector<32x256xf32>
    %12 = math.exp %11 : vector<32x256xf32>
    %cst_8 = arith.constant 1.000000e+00 : f32
    %13 = vector.broadcast %cst_8 : f32 to vector<32x256xf32>
    %14 = arith.addf %13, %12 : vector<32x256xf32>
    %15 = arith.divf %13, %14 : vector<32x256xf32>
    %16 = arith.mulf %9, %15 : vector<32x256xf32>
    %c1 = arith.constant 1 : index
    %c0_9 = arith.constant 0 : index
    %c0_10 = arith.constant 0 : index
    %17 = vector.load %arg3[%c1, %c0_9, %c0_10] : memref<4x64x32xf32, #tpu.memory_space<vmem>>, vector<1x64x32xf32>
    %18 = vector.shape_cast %17 : vector<1x64x32xf32> to vector<64x32xf32>
    %cst_11 = arith.constant dense<0.000000e+00> : vector<64x256xf32>
    %19 = tpu.matmul %18, %16, %cst_11 {dimension_numbers = #tpu.dot_dimension_numbers<[1], [0], [0], [1], [0, 0, 1, 1], [], []>} : vector<64x32xf32>, vector<32x256xf32>, vector<64x256xf32> -> vector<64x256xf32>
    %c1_12 = arith.constant 1 : index
    %c0_13 = arith.constant 0 : index
    %c0_14 = arith.constant 0 : index
    %20 = vector.load %arg4[%c1_12, %c0_13, %c0_14] : memref<4x64x1xf32, #tpu.memory_space<vmem>>, vector<1x64x1xf32>
    %21 = vector.shape_cast %20 : vector<1x64x1xf32> to vector<64x1xf32>
    %22 = vector.broadcast %21 : vector<64x1xf32> to vector<64x256xf32>
    %23 = arith.addf %19, %22 : vector<64x256xf32>
    %24 = vector.extract_strided_slice %23 {offsets = [0, 0], sizes = [32, 256], strides = [1, 1]} : vector<64x256xf32> to vector<32x256xf32>
    %25 = vector.extract_strided_slice %23 {offsets = [32, 0], sizes = [32, 256], strides = [1, 1]} : vector<64x256xf32> to vector<32x256xf32>
    %26 = arith.negf %25 : vector<32x256xf32>
    %27 = math.exp %26 : vector<32x256xf32>
    %cst_15 = arith.constant 1.000000e+00 : f32
    %28 = vector.broadcast %cst_15 : f32 to vector<32x256xf32>
    %29 = arith.addf %28, %27 : vector<32x256xf32>
    %30 = arith.divf %28, %29 : vector<32x256xf32>
    %31 = arith.mulf %24, %30 : vector<32x256xf32>
    %32 = arith.addf %16, %31 : vector<32x256xf32>
    %c2 = arith.constant 2 : index
    %c0_16 = arith.constant 0 : index
    %c0_17 = arith.constant 0 : index
    %33 = vector.load %arg3[%c2, %c0_16, %c0_17] : memref<4x64x32xf32, #tpu.memory_space<vmem>>, vector<1x64x32xf32>
    %34 = vector.shape_cast %33 : vector<1x64x32xf32> to vector<64x32xf32>
    %cst_18 = arith.constant dense<0.000000e+00> : vector<64x256xf32>
    %35 = tpu.matmul %34, %31, %cst_18 {dimension_numbers = #tpu.dot_dimension_numbers<[1], [0], [0], [1], [0, 0, 1, 1], [], []>} : vector<64x32xf32>, vector<32x256xf32>, vector<64x256xf32> -> vector<64x256xf32>
    %c2_19 = arith.constant 2 : index
    %c0_20 = arith.constant 0 : index
    %c0_21 = arith.constant 0 : index
    %36 = vector.load %arg4[%c2_19, %c0_20, %c0_21] : memref<4x64x1xf32, #tpu.memory_space<vmem>>, vector<1x64x1xf32>
    %37 = vector.shape_cast %36 : vector<1x64x1xf32> to vector<64x1xf32>
    %38 = vector.broadcast %37 : vector<64x1xf32> to vector<64x256xf32>
    %39 = arith.addf %35, %38 : vector<64x256xf32>
    %40 = vector.extract_strided_slice %39 {offsets = [0, 0], sizes = [32, 256], strides = [1, 1]} : vector<64x256xf32> to vector<32x256xf32>
    %41 = vector.extract_strided_slice %39 {offsets = [32, 0], sizes = [32, 256], strides = [1, 1]} : vector<64x256xf32> to vector<32x256xf32>
    %42 = arith.negf %41 : vector<32x256xf32>
    %43 = math.exp %42 : vector<32x256xf32>
    %cst_22 = arith.constant 1.000000e+00 : f32
    %44 = vector.broadcast %cst_22 : f32 to vector<32x256xf32>
    %45 = arith.addf %44, %43 : vector<32x256xf32>
    %46 = arith.divf %44, %45 : vector<32x256xf32>
    %47 = arith.mulf %40, %46 : vector<32x256xf32>
    %48 = arith.addf %32, %47 : vector<32x256xf32>
    %c3 = arith.constant 3 : index
    %c0_23 = arith.constant 0 : index
    %c0_24 = arith.constant 0 : index
    %49 = vector.load %arg3[%c3, %c0_23, %c0_24] : memref<4x64x32xf32, #tpu.memory_space<vmem>>, vector<1x64x32xf32>
    %50 = vector.shape_cast %49 : vector<1x64x32xf32> to vector<64x32xf32>
    %cst_25 = arith.constant dense<0.000000e+00> : vector<64x256xf32>
    %51 = tpu.matmul %50, %47, %cst_25 {dimension_numbers = #tpu.dot_dimension_numbers<[1], [0], [0], [1], [0, 0, 1, 1], [], []>} : vector<64x32xf32>, vector<32x256xf32>, vector<64x256xf32> -> vector<64x256xf32>
    %c3_26 = arith.constant 3 : index
    %c0_27 = arith.constant 0 : index
    %c0_28 = arith.constant 0 : index
    %52 = vector.load %arg4[%c3_26, %c0_27, %c0_28] : memref<4x64x1xf32, #tpu.memory_space<vmem>>, vector<1x64x1xf32>
    %53 = vector.shape_cast %52 : vector<1x64x1xf32> to vector<64x1xf32>
    %54 = vector.broadcast %53 : vector<64x1xf32> to vector<64x256xf32>
    %55 = arith.addf %51, %54 : vector<64x256xf32>
    %56 = vector.extract_strided_slice %55 {offsets = [0, 0], sizes = [32, 256], strides = [1, 1]} : vector<64x256xf32> to vector<32x256xf32>
    %57 = vector.extract_strided_slice %55 {offsets = [32, 0], sizes = [32, 256], strides = [1, 1]} : vector<64x256xf32> to vector<32x256xf32>
    %58 = arith.negf %57 : vector<32x256xf32>
    %59 = math.exp %58 : vector<32x256xf32>
    %cst_29 = arith.constant 1.000000e+00 : f32
    %60 = vector.broadcast %cst_29 : f32 to vector<32x256xf32>
    %61 = arith.addf %60, %59 : vector<32x256xf32>
    %62 = arith.divf %60, %61 : vector<32x256xf32>
    %63 = arith.mulf %56, %62 : vector<32x256xf32>
    %64 = arith.addf %48, %63 : vector<32x256xf32>
    %c0_30 = arith.constant 0 : index
    %c0_31 = arith.constant 0 : index
    %c0_32 = arith.constant 0 : index
    %65 = vector.load %arg5[%c0_30, %c0_31, %c0_32] : memref<1x32x256xf32, #tpu.memory_space<vmem>>, vector<1x32x256xf32>
    %66 = vector.shape_cast %65 : vector<1x32x256xf32> to vector<32x256xf32>
    %67 = vector.shape_cast %64 : vector<32x256xf32> to vector<1x32x256xf32>
    tpu.vector_store %arg5[%c0_30, %c0_31, %c0_32], %67 {strides = array<i32>} : memref<1x32x256xf32, #tpu.memory_space<vmem>>, vector<1x32x256xf32>,
    return
  }
  func.func @transform_0(%arg0: i32, %arg1: i32) -> (i32, i32, i32) {
    %c0_i32 = arith.constant 0 : i32
    %c0_i32_0 = arith.constant 0 : i32
    return %arg1, %c0_i32, %arg0 : i32, i32, i32
  }
  func.func @transform_1(%arg0: i32, %arg1: i32) -> (i32, i32, i32) {
    %c0_i32 = arith.constant 0 : i32
    %c0_i32_0 = arith.constant 0 : i32
    %c0_i32_1 = arith.constant 0 : i32
    %c0_i32_2 = arith.constant 0 : i32
    return %c0_i32, %c0_i32_0, %c0_i32_1 : i32, i32, i32
  }
  func.func @transform_2(%arg0: i32, %arg1: i32) -> (i32, i32, i32) {
    %c0_i32 = arith.constant 0 : i32
    %c0_i32_0 = arith.constant 0 : i32
    %c0_i32_1 = arith.constant 0 : i32
    %c0_i32_2 = arith.constant 0 : i32
    return %c0_i32, %c0_i32_0, %c0_i32_1 : i32, i32, i32
  }
  func.func @transform_3(%arg0: i32, %arg1: i32) -> (i32, i32, i32) {
    %c0_i32 = arith.constant 0 : i32
    %c0_i32_0 = arith.constant 0 : i32
    return %arg1, %c0_i32, %arg0 : i32, i32, i32
  }
}

</mosaic_0001>

<bundles_post_ra>
// kernel: tpu_custom_call.1
= control target key start
LH: loop header
LB: loop body
LE: loop exit
PB: predicated region body
PF: predicated region fallthrough
CT: control target
= control target key end

     0   :  { %8 = vsyncpa [#allocation3], 0  ;;  %s2361_s0 = inlined_call_operand.vmem [shape: f32[2,32,256], index: 0, kind: input, shape index: {}]   ;;  %s2362_s1 = inlined_call_operand.vmem [shape: f32[4,64,32], index: 1, kind: input, shape index: {}]   ;;  %s2363_s2 = inlined_call_operand.vmem [shape: f32[4,64,1], index: 2, kind: input, shape index: {}]   ;;  %s2364_s3 = inlined_call_operand.hbm [shape: f32[2,32,256], index: 3, kind: output, shape index: {}]  }
   0x1   :  { %10 = vsyncpa [#allocation3 + $0x1], 0  ;;  %s1791_s12 = smov 0   ;;  %s1793_s13 = smov 0  }
   0x2   :  { %s1795_s14 = smov 0   ;;  %s1797_s15 = smov 0  }
   0x3   :  { %s1799_s16 = smov 0   ;;  %s1801_s17 = smov 0  }
   0x4 LB: > { %s1338_s18 = sadd.s32 4294967295, %s1764_s17   ;;  %s1339_s19 = sadd.s32 4294967294, %s1764_s17   ;;  %s1764_s17 = sphi %s1801_s17, %s16_s17   ;;  %s1760_s16 = sphi %s1799_s16, %s2371_s16   ;;  %s1756_s15 = sphi %s1797_s15, %s2370_s15   ;;  %s1752_s14 = sphi %s1795_s14, %s2369_s14   ;;  %s1748_s13 = sphi %s1793_s13, %s2368_s13   ;;  %s1744_s12 = sphi %s1791_s12, %s2367_s12  }
   0x5   : > { %s25_s20 = sadd.s32 1, %s1760_s16  ;;  %s107_s21 = sadd.s32 1, %s1752_s14 }
   0x6   : > { %p26_p0 = scmp.ge.s32.totalorder %s25_s20, 2  ;;  %p117_p1 = scmp.ne.s32.totalorder %s1752_s14, %s1748_s13 }
   0x7   : > { %p118_p2 = scmp.eq.s32.totalorder %s1338_s18, 1  ;;  %p123_p3 = scmp.ne.s32.totalorder %s1748_s13, %s1744_s12 }
   0x8   : > { %s2373_s20 = smov (%p26_p0, %s25_s20), 0  ;;  %p124_p5 = scmp.eq.s32.totalorder %s1339_s19, 1 }
   0x9   : > { %p1831_p4 = por %p118_p2, %p117_p1  ;;  %s102_s23 = ssub.s32 %s1760_s16, %s2373_s20 }
   0xa   : > { %p1342_p6 = scmp.ge.s32.totalorder %s1764_s17, 1  ;;  %p105_p7 = scmp.eq.s32.totalorder %s102_s23, 0 }
   0xb   : > { %p1838_p8 = por %p124_p5, %p123_p3  ;;  %p161_p9 = scmp.lt.s32.totalorder %s1764_s17, 3 }
   0xc   : > { %s1844_s25 = scalar_select %p105_p7, %s1752_s14, %s107_s21  }
   0xd   : > { %p162_p10 = pnand %p1342_p6, %p161_p9 }
   0xe   : > { %p190_p11 = scmp.lt.s32.totalorder (!%p162_p10), %s1756_s15, 1  ;;  %v1766_v0 = vmov (!%p162_p10), 0.0   ;;  %v1767_v1 = vmov (!%p162_p10), 0   ;;  %v220_v2 = vld [vmem:[%s2363_s2 + $0x20] sm:$0xff] (!%p162_p10)  ;;  %v222_v3 = vld [vmem:[%s2363_s2 + $0x30] sm:$0xff] (!%p162_p10)  ;;  %v221_v4 = vld [vmem:[%s2363_s2 + $0x28] sm:$0xff] (!%p162_p10) }
   0xf   : > { %165 = sbr.rel (%p162_p10) target bundleno = 1164 (0x48c), region = 32  ;;  %353 = vmatprep.mubr.f32.mxu0 (!%p162_p10), %v1766_v0  ;;  %604 = vmatprep.mubr.f32.mxu1 (!%p162_p10), %v1766_v0  ;;  %v223_v5 = vld [vmem:[%s2363_s2 + $0x38] sm:$0xff] (!%p162_p10)  ;;  %v216_v17 = vld [vmem:[%s2363_s2] sm:$0xff] (!%p162_p10)  ;;  %v217_v18 = vld [vmem:[%s2363_s2 + $0x8] sm:$0xff] (!%p162_p10)  ;;  %vm264_vm0 = vcmask (!%p162_p10), 261120   ;;  %s186_s19 = sand.u32 (!%p162_p10), 1, %s1748_s13  }
  0x10   : > { %1556 = vset.pattern.permute.xlu0 (!%p162_p10), %v1767_v1  ;;  %1557 = vset.pattern.permute.xlu1 (!%p162_p10), %v1767_v1  ;;  %v218_v20 = vld [vmem:[%s2363_s2 + $0x10] sm:$0xff] (!%p162_p10)  ;;  %v219_v21 = vld [vmem:[%s2363_s2 + $0x18] sm:$0xff] (!%p162_p10)  ;;  %v208_v22 = vld [vmem:[%s2362_s1] sm:$0xff] (!%p162_p10)  ;;  %s1343_s21 = sshll.u32 (!%p162_p10), %s186_s19, 6  ;;  %s1768_s5 = smov (!%p162_p10), [#allocation2]  }
  0x11   : > { %246 = vperm.xlu0 (!%p162_p10), %1556, %v220_v2   ;;  %256 = vperm.xlu1 (!%p162_p10), %1557, %v222_v3   ;;  %v1374_v23 = vld [vmem:[%s2363_s2 + $0x60] sm:$0xff] (!%p162_p10)  ;;  %v1375_v24 = vld [vmem:[%s2363_s2 + $0x68] sm:$0xff] (!%p162_p10)  ;;  %v1376_v26 = vld [vmem:[%s2363_s2 + $0x70] sm:$0xff] (!%p162_p10)  ;;  %s2284_s23 = scalar_lea.vmem (!%p162_p10), [#allocation2], %s1343_s21  ;;  %s1690_s6 = sshll.u32 (!%p162_p10), %s1768_s5, 4  ;;  %s1691_s6 = int_to_ptr.vmem [resolvable:$false] %s1690_s6 }
  0x12   : > { %v209_v25 = vld [vmem:[%s2362_s1 + $0x8] sm:$0xff] (!%p162_p10)  ;;  %v1377_v27 = vld [vmem:[%s2363_s2 + $0x78] sm:$0xff] (!%p162_p10)  ;;  %v210_v28 = vld [vmem:[%s2362_s1 + $0x10] sm:$0xff] (!%p162_p10)  ;;  %s1259_s27 = sshll.u32 (!%p162_p10), %s2284_s23, 4  ;;  %s1692_s7 = scalar_lea.vmem (!%p162_p10), %s1691_s6, 2048  ;;  %s2309_s27 = int_to_ptr.vmem [resolvable:$true] %s1259_s27 }
  0x13   : > { %v1370_v29 = vld [vmem:[%s2363_s2 + $0x40] sm:$0xff] (!%p162_p10)  ;;  %v1371_v30 = vld [vmem:[%s2363_s2 + $0x48] sm:$0xff] (!%p162_p10)  ;;  %v211_v31 = vld [vmem:[%s2362_s1 + $0x18] sm:$0xff] (!%p162_p10)  ;;  %p1693_p1 = scmp.lt.s32.totalorder (!%p162_p10), %s2309_s27, %s1691_s6 }
  0x14   : > { %v1372_v32 = vld [vmem:[%s2363_s2 + $0x50] sm:$0xff] (!%p162_p10)  ;;  %v1373_v33 = vld [vmem:[%s2363_s2 + $0x58] sm:$0xff] (!%p162_p10)  ;;  %v212_v34 = vld [vmem:[%s2362_s1 + $0x20] sm:$0xff] (!%p162_p10) }
  0x15   : > { %251 = vperm.xlu0 (!%p162_p10), %1556, %v221_v4   ;;  %261 = vperm.xlu1 (!%p162_p10), %1557, %v223_v5   ;;  %v1406_v35 = vld [vmem:[%s2363_s2 + $0xa0] sm:$0xff] (!%p162_p10)  ;;  %v1407_v36 = vld [vmem:[%s2363_s2 + $0xa8] sm:$0xff] (!%p162_p10)  ;;  %v1408_v38 = vld [vmem:[%s2363_s2 + $0xb0] sm:$0xff] (!%p162_p10) }
  0x16   : > { %s191_s26 = scalar_select %p190_p11, %s1756_s15, 1  ;;  %v213_v37 = vld [vmem:[%s2362_s1 + $0x28] sm:$0xff]  ;;  %v1409_v39 = vld [vmem:[%s2363_s2 + $0xb8] sm:$0xff]  ;;  %v214_v40 = vld [vmem:[%s2362_s1 + $0x30] sm:$0xff] }
  0x17   : > { %v1402_v41 = vld [vmem:[%s2363_s2 + $0x80] sm:$0xff]  ;;  %v1403_v42 = vld [vmem:[%s2363_s2 + $0x88] sm:$0xff]  ;;  %v215_v43 = vld [vmem:[%s2362_s1 + $0x38] sm:$0xff] }
  0x18   : > { %s1463_s4 = sshll.u32 %s191_s26, 6  ;;  %v1404_v44 = vld [vmem:[%s2363_s2 + $0x90] sm:$0xff]  ;;  %v1405_v45 = vld [vmem:[%s2363_s2 + $0x98] sm:$0xff]  ;;  %v1438_v46 = vld [vmem:[%s2363_s2 + $0xe0] sm:$0xff]  ;;  %s1464_s26 = sshll.u32 %s1756_s15, 10 }
  0x19   : > { %s197_s9 = scalar_lea.vmem %s2361_s0, %s1463_s4  ;;  %226 = vperm.xlu0 %1556, %v216_v17   ;;  %231 = vperm.xlu1 %1557, %v217_v18   ;;  %v1439_v47 = vld [vmem:[%s2363_s2 + $0xe8] sm:$0xff]  ;;  %v1440_v48 = vld [vmem:[%s2363_s2 + $0xf0] sm:$0xff]  ;;  %v1441_v49 = vld [vmem:[%s2363_s2 + $0xf8] sm:$0xff]  ;;  %s2307_s30 = scalar_lea.hbm %s2364_s3, %s1464_s26 }
  0x1a   : > { %v201_v6 = vld [vmem:[%s197_s9 + $0x8] sm:$0xff]  ;;  %v203_v7 = vld [vmem:[%s197_s9 + $0x18] sm:$0xff]  ;;  %v200_v8 = vld [vmem:[%s197_s9] sm:$0xff]  ;;  %s2315_s15 = scalar_lea.sflag [#allocation3], %s186_s19  ;;  %s1686_s4 = scalar_lea.vmem %s2309_s27, 1024 }
  0x1b   : > { %v1465_v9 = vpack.c.bf16 %v203_v7, %v201_v6  ;;  %v202_v10 = vld [vmem:[%s197_s9 + $0x10] sm:$0xff]  ;;  %v205_v11 = vld [vmem:[%s197_s9 + $0x28] sm:$0xff]  ;;  %v207_v12 = vld [vmem:[%s197_s9 + $0x38] sm:$0xff]  ;;  %p1687_p12 = scmp.ne.s32.totalorder %s2309_s27, %s1686_s4  ;;  %p1694_p2 = scmp.lt.s32.totalorder %s1692_s7, %s1686_s4 }
  0x1c   : > { %v1467_v13 = vpack.c.bf16 %v202_v10, %v200_v8  ;;  %v1469_v14 = vpack.c.bf16 %v207_v12, %v205_v11  ;;  %v204_v15 = vld [vmem:[%s197_s9 + $0x20] sm:$0xff]  ;;  %v206_v16 = vld [vmem:[%s197_s9 + $0x30] sm:$0xff]  ;;  %v1435_v51 = vld [vmem:[%s2363_s2 + $0xc8] sm:$0xff] }
  0x1d   : > { %1466 = vmatprep.subr.bf16.mxu0 %v1465_v9  ;;  %v1471_v19 = vpack.c.bf16 %v206_v16, %v204_v15  ;;  %236 = vperm.xlu0 %1556, %v218_v20   ;;  %v1434_v50 = vld [vmem:[%s2363_s2 + $0xc0] sm:$0xff]  ;;  %v1436_v52 = vld [vmem:[%s2363_s2 + $0xd0] sm:$0xff]  ;;  %v1437_v53 = vld [vmem:[%s2363_s2 + $0xd8] sm:$0xff]  ;;  %p1688_p13 = pnand %p1687_p12, %p1831_p4  ;;  %p1695_p3 = por %p1694_p2, %p1693_p1 }
  0x1e   : > { %1468 = vmatpush1.bf16.msra.mxu0 %v1467_v13  ;;  %241 = vperm.xlu1 %1557, %v219_v21  }
  0x1f   : > { %1470 = vmatprep.subr.bf16.mxu0 %v1469_v14  ;;  %p1689_p0 = pneg %p1688_p13 }
  0x21   : > { %498 = vperm.xlu0 %1556, %v1374_v23   ;;  %p1696_p5 = pnand %p1695_p3, %p1689_p0 }
  0x22   : > { %1472 = vmatpush1.bf16.msra.mxu0 %v1471_v19  ;;  %503 = vperm.xlu1 %1557, %v1375_v24  }
  0x25   : > { %1346 = vmatmul.mubr.msk.f32.vlgmr.msra.gmra.mrb[0].mxu0 %vm264_vm0, %v208_v22  ;;  %508 = vperm.xlu0 %1556, %v1376_v26  }
  0x26   : > { %359 = vmatprep.mubr.f32.mxu0 %v1766_v0  ;;  %513 = vperm.xlu1 %1557, %v1377_v27  }
  0x29   : > { %1347 = vmatmul.mubr.msk.f32.gmra.mrb[2].mxu0 %vm264_vm0, %v209_v25  ;;  %478 = vperm.xlu0 %1556, %v1370_v29  }
  0x2a   : > { %365 = vmatprep.mubr.f32.mxu0 %v1766_v0  ;;  %483 = vperm.xlu1 %1557, %v1371_v30  }
  0x2d   : > { %1348 = vmatmul.mubr.msk.f32.gmra.mrb[4].mxu0 %vm264_vm0, %v210_v28  ;;  %488 = vperm.xlu0 %1556, %v1372_v32  }
  0x2e   : > { %371 = vmatprep.mubr.f32.mxu0 %v1766_v0  ;;  %493 = vperm.xlu1 %1557, %v1373_v33  }
  0x31   : > { %1349 = vmatmul.mubr.msk.f32.gmra.mrb[6].mxu0 %vm264_vm0, %v211_v31  ;;  %757 = vperm.xlu0 %1556, %v1406_v35  }
  0x32   : > { %377 = vmatprep.mubr.f32.mxu0 %v1766_v0  ;;  %762 = vperm.xlu1 %1557, %v1407_v36  }
  0x35   : > { %1350 = vmatmul.mubr.msk.f32.gmra.mrb[8].mxu0 %vm264_vm0, %v212_v34  ;;  %767 = vperm.xlu0 %1556, %v1408_v38  }
  0x36   : > { %383 = vmatprep.mubr.f32.mxu0 %v1766_v0  ;;  %772 = vperm.xlu1 %1557, %v1409_v39  }
  0x39   : > { %1351 = vmatmul.mubr.msk.f32.gmra.mrb[10].mxu0 %vm264_vm0, %v213_v37  ;;  %737 = vperm.xlu0 %1556, %v1402_v41  }
  0x3a   : > { %389 = vmatprep.mubr.f32.mxu0 %v1766_v0  ;;  %742 = vperm.xlu1 %1557, %v1403_v42  }
  0x3d   : > { %1352 = vmatmul.mubr.msk.f32.gmra.mrb[12].mxu0 %vm264_vm0, %v214_v40  ;;  %747 = vperm.xlu0 %1556, %v1404_v44  }
  0x3e   : > { %395 = vmatprep.mubr.f32.mxu0 %v1766_v0  ;;  %752 = vperm.xlu1 %1557, %v1405_v45  }
  0x41   : > { %1353 = vmatmul.mubr.msk.f32.gmra.mrb[14].mxu0 %vm264_vm0, %v215_v43  ;;  %1016 = vperm.xlu0 %1556, %v1438_v46  }
  0x42   : > { %863 = vmatprep.mubr.f32.mxu0 %v1766_v0  ;;  %1021 = vperm.xlu1 %1557, %v1439_v47  }
  0x45   : > { %1026 = vperm.xlu0 %1556, %v1440_v48  }
  0x46   : > { %1031 = vperm.xlu1 %1557, %v1441_v49  }
  0x49   : > { %996 = vperm.xlu0 %1556, %v1434_v50  }
  0x4a   : > { %1001 = vperm.xlu1 %1557, %v1435_v51  }
  0x4d   : > { %1006 = vperm.xlu0 %1556, %v1436_v52  }
  0x4e   : > { %1011 = vperm.xlu1 %1557, %v1437_v53  }
  0x90   : > { %v247_v62 = vpop.permute.xlu0 %246  ;;  %v257_v10 = vpop.permute.xlu1 %256 }
  0x94   : > { %v252_v5 = vpop.permute.xlu0 %251  ;;  %v262_v19 = vpop.permute.xlu1 %261 }
  0x98   : > { %v227_v39 = vpop.permute.xlu0 %226  ;;  %v232_v48 = vpop.permute.xlu1 %231 }
  0xf8   : > { %v1989_v54 = vpop.f32.mrb[0].mxu0 }
  0xf9   : > { %v1991_v55 = vpop.f32.mrb[1].mxu0  ;;  %v356_v41 = vadd.f32 %v1989_v54, %v227_v39 }
  0xfa   : > { %v358_v43 = vadd.f32 %v1991_v55, %v227_v39  ;;  %v237_v55 = vpop.permute.xlu0 %236 }
  0xfc   : > { %v1993_v56 = vpop.f32.mrb[2].mxu0 }
  0xfd   : > { %v1995_v57 = vpop.f32.mrb[3].mxu0  ;;  %v362_v50 = vadd.f32 %v1993_v56, %v232_v48 }
  0xfe   : > { %v364_v53 = vadd.f32 %v1995_v57, %v232_v48 }
 0x100   : > { %v1997_v58 = vpop.f32.mrb[4].mxu0 }
 0x101   : > { %v1999_v59 = vpop.f32.mrb[5].mxu0 }
 0x104   : > { %v2001_v60 = vpop.f32.mrb[6].mxu0 }
 0x105   : > { %v2003_v61 = vpop.f32.mrb[7].mxu0 }
 0x108   : > { %v379_v63 = vpop.f32.mrb[8].mxu0 }
 0x109   : > { %v380_v1 = vadd.f32 %v379_v63, %v247_v62  ;;  %v381_v2 = vpop.f32.mrb[9].mxu0 }
 0x10a   : > { %v382_v3 = vadd.f32 %v381_v2, %v247_v62 }
 0x10b   : > { %v1354_v4 = vmul.f32 -1.442695, %v380_v1  ;;  %v368_v1 = vadd.f32 %v1997_v58, %v237_v55 }
 0x10c   : > { %v1355_v6 = vmul.f32 -1.442695, %v382_v3  ;;  %v385_v7 = vpop.f32.mrb[10].mxu0  ;;  %v370_v3 = vadd.f32 %v1999_v59, %v237_v55 }
 0x10d   : > { %1558 = vpow2.f32 %v1354_v4  ;;  %v386_v8 = vadd.f32 %v385_v7, %v252_v5  ;;  %v387_v9 = vpop.f32.mrb[11].mxu0 }
 0x10e   : > { %1560 = vpow2.f32 %v1355_v6  ;;  %v388_v11 = vadd.f32 %v387_v9, %v252_v5  ;;  %v242_v6 = vpop.permute.xlu1 %241 }
 0x10f   : > { %v1356_v12 = vmul.f32 -1.442695, %v386_v8  ;;  %v374_v8 = vadd.f32 %v2001_v60, %v242_v6  ;;  %v376_v59 = vadd.f32 %v2003_v61, %v242_v6  ;;  %v1362_v60 = vld [vmem:[%s2362_s1 + $0x40] sm:$0xff]  ;;  %v1363_v61 = vld [vmem:[%s2362_s1 + $0x48] sm:$0xff] }
 0x110   : > { %v1357_v13 = vmul.f32 -1.442695, %v388_v11  ;;  %v391_v14 = vpop.f32.mrb[12].mxu0 }
 0x111   : > { %1562 = vpow2.f32 %v1356_v12  ;;  %v392_v15 = vadd.f32 %v391_v14, %v257_v10  ;;  %v393_v16 = vpop.f32.mrb[13].mxu0  ;;  %v1364_v14 = vld [vmem:[%s2362_s1 + $0x50] sm:$0xff] }
 0x112   : > { %1564 = vpow2.f32 %v1357_v13  ;;  %v394_v17 = vadd.f32 %v393_v16, %v257_v10  ;;  %v1366_v16 = vld [vmem:[%s2362_s1 + $0x60] sm:$0xff] }
 0x113   : > { %v1358_v18 = vmul.f32 -1.442695, %v392_v15  ;;  %v1365_v15 = vld [vmem:[%s2362_s1 + $0x58] sm:$0xff] }
 0x114   : > { %v1359_v20 = vmul.f32 -1.442695, %v394_v17  ;;  %v397_v21 = vpop.f32.mrb[14].mxu0  ;;  %v1367_v17 = vld [vmem:[%s2362_s1 + $0x68] sm:$0xff] }
 0x115   : > { %1566 = vpow2.f32 %v1358_v18  ;;  %v398_v22 = vadd.f32 %v397_v21, %v262_v19  ;;  %v399_v23 = vpop.f32.mrb[15].mxu0  ;;  %v1368_v18 = vld [vmem:[%s2362_s1 + $0x70] sm:$0xff] }
 0x116   : > { %1568 = vpow2.f32 %v1359_v20  ;;  %v400_v24 = vadd.f32 %v399_v23, %v262_v19  ;;  %v1369_v19 = vld [vmem:[%s2362_s1 + $0x78] sm:$0xff] }
 0x117   : > { %v1559_v25 = vpop.eup %1558  ;;  %v1360_v26 = vmul.f32 -1.442695, %v398_v22 }
 0x118   : > { %v1561_v27 = vpop.eup %1560  ;;  %v426_v28 = vadd.f32 1.0, %v1559_v25  ;;  %v1361_v29 = vmul.f32 -1.442695, %v400_v24 }
 0x119   : > { %v427_v30 = vadd.f32 1.0, %v1561_v27  ;;  %1570 = vpow2.f32 %v1360_v26 }
 0x11a   : > { %1572 = vrcp.f32 %v426_v28  ;;  %v499_v28 = vpop.permute.xlu0 %498 }
 0x11b   : > { %v1563_v31 = vpop.eup %1562  ;;  %1574 = vrcp.f32 %v427_v30 }
 0x11c   : > { %v1565_v32 = vpop.eup %1564  ;;  %v428_v33 = vadd.f32 1.0, %v1563_v31  ;;  %1576 = vpow2.f32 %v1361_v29 }
 0x11d   : > { %v429_v34 = vadd.f32 1.0, %v1565_v32 }
 0x11e   : > { %1578 = vrcp.f32 %v428_v33 }
 0x11f   : > { %v1567_v35 = vpop.eup %1566  ;;  %1580 = vrcp.f32 %v429_v34  ;;  %v504_v34 = vpop.permute.xlu1 %503 }
 0x120   : > { %v1569_v36 = vpop.eup %1568  ;;  %v430_v37 = vadd.f32 1.0, %v1567_v35 }
 0x121   : > { %v431_v38 = vadd.f32 1.0, %v1569_v36 }
 0x122   : > { %1582 = vrcp.f32 %v430_v37 }
 0x123   : > { %v1571_v40 = vpop.eup %1570  ;;  %1584 = vrcp.f32 %v431_v38 }
 0x124   : > { %v1573_v42 = vpop.eup %1572  ;;  %v432_v44 = vadd.f32 1.0, %v1571_v40 }
 0x125   : > { %v1575_v45 = vpop.eup %1574  ;;  %v2007_v46 = vmul.f32 %v1573_v42, %v356_v41  ;;  %v509_v41 = vpop.permute.xlu0 %508 }
 0x126   : > { %v1577_v47 = vpop.eup %1576  ;;  %1586 = vrcp.f32 %v432_v44  ;;  %v2009_v49 = vmul.f32 %v1575_v45, %v358_v43 }
 0x127   : > { %v433_v51 = vadd.f32 1.0, %v1577_v47 }
 0x128   : > { %v1579_v52 = vpop.eup %1578 }
 0x129   : > { %v1581_v54 = vpop.eup %1580  ;;  %1588 = vrcp.f32 %v433_v51  ;;  %v2013_v62 = vmul.f32 %v1579_v52, %v362_v50  ;;  %v514_v50 = vpop.permute.xlu1 %513 }
 0x12a   : > { %v2015_v63 = vmul.f32 %v1581_v54, %v364_v53 }
 0x12b   : > { %v1475_v5 = vpack.c.bf16 %v2013_v62, %v2007_v46 }
 0x12c   : > { %v1583_v2 = vpop.eup %1582  ;;  %v1473_v4 = vpack.c.bf16 %v2015_v63, %v2009_v49 }
 0x12d   : > { %v1585_v56 = vpop.eup %1584  ;;  %v2023_v57 = vmul.f32 %v1583_v2, %v368_v1 }
 0x12e   : > { %1474 = vmatprep.subr.bf16.mxu1 %v1473_v4  ;;  %v2025_v7 = vmul.f32 %v1585_v56, %v370_v3 }
 0x12f   : > { %1476 = vmatpush1.bf16.msra.mxu1 %v1475_v5 }
 0x130   : > { %v1587_v58 = vpop.eup %1586 }
 0x131   : > { %v2028_v9 = vmul.f32 %v1587_v58, %v374_v8 }
 0x133   : > { %v1589_v10 = vpop.eup %1588  ;;  %v1479_v13 = vpack.c.bf16 %v2028_v9, %v2023_v57 }
 0x134   : > { %v2031_v11 = vmul.f32 %v1589_v10, %v376_v59 }
 0x136   : > { %v1477_v12 = vpack.c.bf16 %v2031_v11, %v2025_v7 }
 0x138   : > { %1478 = vmatprep.subr.bf16.mxu1 %v1477_v12 }
 0x139   : > { %1480 = vmatpush1.bf16.msra.mxu1 %v1479_v13 }
 0x13c   : > { %1378 = vmatmul.mubr.msk.f32.vlgmr.msra.gmra.mrb[0].mxu1 %vm264_vm0, %v1362_v60 }
 0x13d   : > { %610 = vmatprep.mubr.f32.mxu1 %v1766_v0 }
 0x140   : > { %1379 = vmatmul.mubr.msk.f32.gmra.mrb[2].mxu1 %vm264_vm0, %v1363_v61  ;;  %v479_v61 = vpop.permute.xlu0 %478 }
 0x141   : > { %616 = vmatprep.mubr.f32.mxu1 %v1766_v0 }
 0x144   : > { %1380 = vmatmul.mubr.msk.f32.gmra.mrb[4].mxu1 %vm264_vm0, %v1364_v14 }
 0x145   : > { %622 = vmatprep.mubr.f32.mxu1 %v1766_v0 }
 0x148   : > { %1381 = vmatmul.mubr.msk.f32.gmra.mrb[6].mxu1 %vm264_vm0, %v1365_v15 }
 0x149   : > { %628 = vmatprep.mubr.f32.mxu1 %v1766_v0 }
 0x14c   : > { %1382 = vmatmul.mubr.msk.f32.gmra.mrb[8].mxu1 %vm264_vm0, %v1366_v16 }
 0x14d   : > { %634 = vmatprep.mubr.f32.mxu1 %v1766_v0 }
 0x150   : > { %1383 = vmatmul.mubr.msk.f32.gmra.mrb[10].mxu1 %vm264_vm0, %v1367_v17 }
 0x151   : > { %640 = vmatprep.mubr.f32.mxu1 %v1766_v0 }
 0x154   : > { %1384 = vmatmul.mubr.msk.f32.gmra.mrb[12].mxu1 %vm264_vm0, %v1368_v18 }
 0x155   : > { %646 = vmatprep.mubr.f32.mxu1 %v1766_v0 }
 0x158   : > { %1385 = vmatmul.mubr.msk.f32.gmra.mrb[14].mxu1 %vm264_vm0, %v1369_v19 }
 0x159   : > { %1122 = vmatprep.mubr.f32.mxu1 %v1766_v0 }
 0x20f   : > { %v2077_v20 = vpop.f32.mrb[0].mxu1 }
 0x210   : > { %v2079_v21 = vpop.f32.mrb[1].mxu1  ;;  %v607_v15 = vadd.f32 %v2077_v20, %v479_v61 }
 0x211   : > { %v609_v17 = vadd.f32 %v2079_v21, %v479_v61  ;;  %v489_v21 = vpop.permute.xlu0 %488 }
 0x213   : > { %v2081_v22 = vpop.f32.mrb[2].mxu1 }
 0x214   : > { %v2083_v23 = vpop.f32.mrb[3].mxu1 }
 0x217   : > { %v2085_v24 = vpop.f32.mrb[4].mxu1 }
 0x218   : > { %v2087_v25 = vpop.f32.mrb[5].mxu1 }
 0x21b   : > { %v2089_v26 = vpop.f32.mrb[6].mxu1 }
 0x21c   : > { %v2091_v27 = vpop.f32.mrb[7].mxu1 }
 0x21f   : > { %v630_v29 = vpop.f32.mrb[8].mxu1 }
 0x220   : > { %v631_v30 = vadd.f32 %v630_v29, %v499_v28  ;;  %v632_v31 = vpop.f32.mrb[9].mxu1 }
 0x221   : > { %v633_v32 = vadd.f32 %v632_v31, %v499_v28 }
 0x222   : > { %v1386_v33 = vmul.f32 -1.442695, %v631_v30  ;;  %v484_v30 = vpop.permute.xlu1 %483 }
 0x223   : > { %v1387_v35 = vmul.f32 -1.442695, %v633_v32  ;;  %v636_v36 = vpop.f32.mrb[10].mxu1  ;;  %v613_v32 = vadd.f32 %v2081_v22, %v484_v30 }
 0x224   : > { %1590 = vpow2.f32 %v1386_v33  ;;  %v637_v37 = vadd.f32 %v636_v36, %v504_v34  ;;  %v638_v38 = vpop.f32.mrb[11].mxu1 }
 0x225   : > { %1592 = vpow2.f32 %v1387_v35  ;;  %v639_v39 = vadd.f32 %v638_v38, %v504_v34  ;;  %v615_v35 = vadd.f32 %v2083_v23, %v484_v30  ;;  %v619_v38 = vadd.f32 %v2085_v24, %v489_v21 }
 0x226   : > { %v1388_v40 = vmul.f32 -1.442695, %v637_v37 }
 0x227   : > { %v1389_v42 = vmul.f32 -1.442695, %v639_v39  ;;  %v642_v43 = vpop.f32.mrb[12].mxu1 }
 0x228   : > { %1594 = vpow2.f32 %v1388_v40  ;;  %v643_v44 = vadd.f32 %v642_v43, %v509_v41  ;;  %v644_v45 = vpop.f32.mrb[13].mxu1  ;;  %v494_v43 = vpop.permute.xlu1 %493 }
 0x229   : > { %1596 = vpow2.f32 %v1389_v42  ;;  %v645_v47 = vadd.f32 %v644_v45, %v509_v41  ;;  %v621_v41 = vadd.f32 %v2087_v25, %v489_v21  ;;  %v625_v45 = vadd.f32 %v2089_v26, %v494_v43  ;;  %v1394_v26 = vld [vmem:[%s2362_s1 + $0x80] sm:$0xff] }
 0x22a   : > { %v1390_v48 = vmul.f32 -1.442695, %v643_v44 }
 0x22b   : > { %v1391_v51 = vmul.f32 -1.442695, %v645_v47  ;;  %v648_v52 = vpop.f32.mrb[14].mxu1 }
 0x22c   : > { %1598 = vpow2.f32 %v1390_v48  ;;  %v649_v53 = vadd.f32 %v648_v52, %v514_v50  ;;  %v650_v54 = vpop.f32.mrb[15].mxu1  ;;  %v627_v48 = vadd.f32 %v2091_v27, %v494_v43  ;;  %v1395_v27 = vld [vmem:[%s2362_s1 + $0x88] sm:$0xff] }
 0x22d   : > { %1600 = vpow2.f32 %v1391_v51  ;;  %v651_v55 = vadd.f32 %v650_v54, %v514_v50  ;;  %v1397_v54 = vld [vmem:[%s2362_s1 + $0x98] sm:$0xff] }
 0x22e   : > { %v1591_v1 = vpop.eup %1590  ;;  %v1392_v2 = vmul.f32 -1.442695, %v649_v53  ;;  %v1396_v53 = vld [vmem:[%s2362_s1 + $0x90] sm:$0xff] }
 0x22f   : > { %v1593_v3 = vpop.eup %1592  ;;  %v677_v4 = vadd.f32 1.0, %v1591_v1  ;;  %v1393_v56 = vmul.f32 -1.442695, %v651_v55  ;;  %v1398_v55 = vld [vmem:[%s2362_s1 + $0xa0] sm:$0xff]  ;;  %v1399_v1 = vld [vmem:[%s2362_s1 + $0xa8] sm:$0xff] }
 0x230   : > { %v678_v5 = vadd.f32 1.0, %v1593_v3  ;;  %1602 = vpow2.f32 %v1392_v2  ;;  %v1400_v2 = vld [vmem:[%s2362_s1 + $0xb0] sm:$0xff]  ;;  %v1401_v3 = vld [vmem:[%s2362_s1 + $0xb8] sm:$0xff] }
 0x231   : > { %1604 = vrcp.f32 %v677_v4 }
 0x232   : > { %v1595_v6 = vpop.eup %1594  ;;  %1606 = vrcp.f32 %v678_v5 }
 0x233   : > { %v1597_v8 = vpop.eup %1596  ;;  %v679_v58 = vadd.f32 1.0, %v1595_v6  ;;  %1608 = vpow2.f32 %v1393_v56 }
 0x234   : > { %v680_v59 = vadd.f32 1.0, %v1597_v8 }
 0x235   : > { %1610 = vrcp.f32 %v679_v58 }
 0x236   : > { %v1599_v10 = vpop.eup %1598  ;;  %1612 = vrcp.f32 %v680_v59 }
 0x237   : > { %v1601_v12 = vpop.eup %1600  ;;  %v681_v13 = vadd.f32 1.0, %v1599_v10 }
 0x238   : > { %v682_v60 = vadd.f32 1.0, %v1601_v12  ;;  %v758_v12 = vpop.permute.xlu0 %757 }
 0x239   : > { %1614 = vrcp.f32 %v681_v13 }
 0x23a   : > { %v1603_v14 = vpop.eup %1602  ;;  %1616 = vrcp.f32 %v682_v60 }
 0x23b   : > { %v1605_v16 = vpop.eup %1604  ;;  %v683_v18 = vadd.f32 1.0, %v1603_v14 }
 0x23c   : > { %v1607_v19 = vpop.eup %1606  ;;  %v2095_v28 = vmul.f32 %v1605_v16, %v607_v15  ;;  %v763_v16 = vpop.permute.xlu1 %762 }
 0x23d   : > { %v1609_v29 = vpop.eup %1608  ;;  %1618 = vrcp.f32 %v683_v18  ;;  %v2097_v31 = vmul.f32 %v1607_v19, %v609_v17 }
 0x23e   : > { %v684_v33 = vadd.f32 1.0, %v1609_v29 }
 0x23f   : > { %v1611_v34 = vpop.eup %1610 }
 0x240   : > { %v1613_v20 = vpop.eup %1612  ;;  %1620 = vrcp.f32 %v684_v33  ;;  %v2101_v36 = vmul.f32 %v1611_v34, %v613_v32  ;;  %v768_v33 = vpop.permute.xlu0 %767 }
 0x241   : > { %v2103_v37 = vmul.f32 %v1613_v20, %v615_v35 }
 0x242   : > { %v1483_v39 = vpack.c.bf16 %v2101_v36, %v2095_v28 }
 0x243   : > { %v1615_v40 = vpop.eup %1614  ;;  %v1481_v22 = vpack.c.bf16 %v2103_v37, %v2097_v31 }
 0x244   : > { %v1617_v42 = vpop.eup %1616  ;;  %v2111_v23 = vmul.f32 %v1615_v40, %v619_v38  ;;  %v773_v40 = vpop.permute.xlu1 %772 }
 0x245   : > { %1482 = vmatprep.subr.bf16.mxu0 %v1481_v22  ;;  %v2113_v44 = vmul.f32 %v1617_v42, %v621_v41 }
 0x246   : > { %1484 = vmatpush1.bf16.msra.mxu0 %v1483_v39 }
 0x247   : > { %v1619_v24 = vpop.eup %1618 }
 0x248   : > { %v2116_v47 = vmul.f32 %v1619_v24, %v625_v45 }
 0x24a   : > { %v1621_v50 = vpop.eup %1620  ;;  %v1487_v25 = vpack.c.bf16 %v2116_v47, %v2111_v23 }
 0x24b   : > { %v2121_v51 = vmul.f32 %v1621_v50, %v627_v48 }
 0x24d   : > { %v1485_v52 = vpack.c.bf16 %v2121_v51, %v2113_v44 }
 0x24f   : > { %1486 = vmatprep.subr.bf16.mxu0 %v1485_v52 }
 0x250   : > { %1488 = vmatpush1.bf16.msra.mxu0 %v1487_v25 }
 0x253   : > { %1410 = vmatmul.mubr.msk.f32.vlgmr.msra.gmra.mrb[16].mxu0 %vm264_vm0, %v1394_v26 }
 0x254   : > { %869 = vmatprep.mubr.f32.mxu0 %v1766_v0 }
 0x257   : > { %1411 = vmatmul.mubr.msk.f32.gmra.mrb[18].mxu0 %vm264_vm0, %v1395_v27 }
 0x258   : > { %875 = vmatprep.mubr.f32.mxu0 %v1766_v0 }
 0x25b   : > { %1412 = vmatmul.mubr.msk.f32.gmra.mrb[20].mxu0 %vm264_vm0, %v1396_v53 }
 0x25c   : > { %881 = vmatprep.mubr.f32.mxu0 %v1766_v0 }
 0x25f   : > { %1413 = vmatmul.mubr.msk.f32.gmra.mrb[22].mxu0 %vm264_vm0, %v1397_v54 }
 0x260   : > { %887 = vmatprep.mubr.f32.mxu0 %v1766_v0 }
 0x263   : > { %1414 = vmatmul.mubr.msk.f32.gmra.mrb[24].mxu0 %vm264_vm0, %v1398_v55 }
 0x264   : > { %893 = vmatprep.mubr.f32.mxu0 %v1766_v0 }
 0x267   : > { %1415 = vmatmul.mubr.msk.f32.gmra.mrb[26].mxu0 %vm264_vm0, %v1399_v1 }
 0x268   : > { %899 = vmatprep.mubr.f32.mxu0 %v1766_v0 }
 0x26b   : > { %1416 = vmatmul.mubr.msk.f32.gmra.mrb[28].mxu0 %vm264_vm0, %v1400_v2 }
 0x26c   : > { %905 = vmatprep.mubr.f32.mxu0 %v1766_v0 }
 0x26f   : > { %1417 = vmatmul.mubr.msk.f32.gmra.mrb[30].mxu0 %vm264_vm0, %v1401_v3 }
 0x326   : > { %v2164_v4 = vpop.f32.mrb[16].mxu0 }
 0x327   : > { %v2166_v56 = vpop.f32.mrb[17].mxu0 }
 0x32a   : > { %v2168_v5 = vpop.f32.mrb[18].mxu0 }
 0x32b   : > { %v2170_v6 = vpop.f32.mrb[19].mxu0 }
 0x32e   : > { %v2172_v8 = vpop.f32.mrb[20].mxu0 }
 0x32f   : > { %v2174_v58 = vpop.f32.mrb[21].mxu0 }
 0x332   : > { %v2176_v59 = vpop.f32.mrb[22].mxu0 }
 0x333   : > { %v2178_v10 = vpop.f32.mrb[23].mxu0 }
 0x336   : > { %v889_v13 = vpop.f32.mrb[24].mxu0 }
 0x337   : > { %v890_v60 = vadd.f32 %v889_v13, %v758_v12  ;;  %v891_v61 = vpop.f32.mrb[25].mxu0  ;;  %v738_v13 = vpop.permute.xlu0 %737 }
 0x338   : > { %v892_v14 = vadd.f32 %v891_v61, %v758_v12  ;;  %v866_v61 = vadd.f32 %v2164_v4, %v738_v13 }
 0x339   : > { %v1418_v15 = vmul.f32 -1.442695, %v890_v60 }
 0x33a   : > { %v1419_v17 = vmul.f32 -1.442695, %v892_v14  ;;  %v895_v18 = vpop.f32.mrb[26].mxu0 }
 0x33b   : > { %1622 = vpow2.f32 %v1418_v15  ;;  %v896_v19 = vadd.f32 %v895_v18, %v763_v16  ;;  %v897_v29 = vpop.f32.mrb[27].mxu0  ;;  %v868_v15 = vadd.f32 %v2166_v56, %v738_v13  ;;  %v709_v18 = vadd.f32 %v2095_v28, %v2007_v46 }
 0x33c   : > { %1624 = vpow2.f32 %v1419_v17  ;;  %v898_v30 = vadd.f32 %v897_v29, %v763_v16  ;;  %v711_v46 = vadd.f32 %v2101_v36, %v2013_v62  ;;  %v713_v62 = vadd.f32 %v2111_v23, %v2023_v57 }
 0x33d   : > { %v1420_v32 = vmul.f32 -1.442695, %v896_v19 }
 0x33e   : > { %v1421_v34 = vmul.f32 -1.442695, %v898_v30  ;;  %v901_v35 = vpop.f32.mrb[28].mxu0  ;;  %v743_v30 = vpop.permute.xlu1 %742 }
 0x33f   : > { %1626 = vpow2.f32 %v1420_v32  ;;  %v902_v20 = vadd.f32 %v901_v35, %v768_v33  ;;  %v903_v21 = vpop.f32.mrb[29].mxu0  ;;  %v710_v32 = vadd.f32 %v2097_v31, %v2009_v49  ;;  %v874_v56 = vadd.f32 %v2170_v6, %v743_v30 }
 0x340   : > { %1628 = vpow2.f32 %v1421_v34  ;;  %v904_v38 = vadd.f32 %v903_v21, %v768_v33  ;;  %v872_v34 = vadd.f32 %v2168_v5, %v743_v30  ;;  %v712_v49 = vadd.f32 %v2103_v37, %v2015_v63 }
 0x341   : > { %v1422_v39 = vmul.f32 -1.442695, %v902_v20  ;;  %v714_v63 = vadd.f32 %v2113_v44, %v2025_v7  ;;  %v716_v44 = vadd.f32 %v2121_v51, %v2031_v11  ;;  %v1428_v11 = vld [vmem:[%s2362_s1 + $0xd0] sm:$0xff]  ;;  %v1429_v51 = vld [vmem:[%s2362_s1 + $0xd8] sm:$0xff] }
 0x342   : > { %v1423_v41 = vmul.f32 -1.442695, %v904_v38  ;;  %v907_v22 = vpop.f32.mrb[30].mxu0 }
 0x343   : > { %1630 = vpow2.f32 %v1422_v39  ;;  %v908_v42 = vadd.f32 %v907_v22, %v773_v40  ;;  %v909_v43 = vpop.f32.mrb[31].mxu0  ;;  %v748_v39 = vpop.permute.xlu0 %747 }
 0x344   : > { %1632 = vpow2.f32 %v1423_v41  ;;  %v910_v45 = vadd.f32 %v909_v43, %v773_v40  ;;  %v878_v5 = vadd.f32 %v2172_v8, %v748_v39  ;;  %v880_v6 = vadd.f32 %v2174_v58, %v748_v39 }
 0x345   : > { %v1623_v24 = vpop.eup %1622  ;;  %v1424_v48 = vmul.f32 -1.442695, %v908_v42 }
 0x346   : > { %v1625_v50 = vpop.eup %1624  ;;  %v936_v25 = vadd.f32 1.0, %v1623_v24  ;;  %v1425_v52 = vmul.f32 -1.442695, %v910_v45  ;;  %v753_v24 = vpop.permute.xlu1 %752 }
 0x347   : > { %v937_v26 = vadd.f32 1.0, %v1625_v50  ;;  %1634 = vpow2.f32 %v1424_v48  ;;  %v884_v8 = vadd.f32 %v2176_v59, %v753_v24  ;;  %v886_v57 = vadd.f32 %v2178_v10, %v753_v24  ;;  %v1430_v10 = vld [vmem:[%s2362_s1 + $0xe0] sm:$0xff] }
 0x348   : > { %1636 = vrcp.f32 %v936_v25  ;;  %v715_v25 = vadd.f32 %v2116_v47, %v2028_v9  ;;  %v1426_v9 = vld [vmem:[%s2362_s1 + $0xc0] sm:$0xff]  ;;  %v1427_v47 = vld [vmem:[%s2362_s1 + $0xc8] sm:$0xff] }
 0x349   : > { %v1627_v27 = vpop.eup %1626  ;;  %1638 = vrcp.f32 %v937_v26 }
 0x34a   : > { %v1629_v53 = vpop.eup %1628  ;;  %v938_v54 = vadd.f32 1.0, %v1627_v27  ;;  %1640 = vpow2.f32 %v1425_v52  ;;  %v1022_v30 = vpop.permute.xlu1 %1021 }
 0x34b   : > { %v939_v55 = vadd.f32 1.0, %v1629_v53 }
 0x34c   : > { %1642 = vrcp.f32 %v938_v54  ;;  %v1431_v54 = vld [vmem:[%s2362_s1 + $0xe8] sm:$0xff] }
 0x34d   : > { %v1631_v1 = vpop.eup %1630  ;;  %1644 = vrcp.f32 %v939_v55  ;;  %v1432_v55 = vld [vmem:[%s2362_s1 + $0xf0] sm:$0xff] }
 0x34e   : > { %v1633_v2 = vpop.eup %1632  ;;  %v940_v3 = vadd.f32 1.0, %v1631_v1  ;;  %v1433_v1 = vld [vmem:[%s2362_s1 + $0xf8] sm:$0xff] }
 0x34f   : > { %v941_v12 = vadd.f32 1.0, %v1633_v2 }
 0x350   : > { %1646 = vrcp.f32 %v940_v3 }
 0x351   : > { %v1635_v60 = vpop.eup %1634  ;;  %1648 = vrcp.f32 %v941_v12 }
 0x352   : > { %v1637_v14 = vpop.eup %1636  ;;  %v942_v16 = vadd.f32 1.0, %v1635_v60 }
 0x353   : > { %v1639_v17 = vpop.eup %1638  ;;  %v960_v19 = vmul.f32 %v1637_v14, %v866_v61 }
 0x354   : > { %v1641_v29 = vpop.eup %1640  ;;  %1650 = vrcp.f32 %v942_v16  ;;  %v961_v33 = vmul.f32 %v1639_v17, %v868_v15  ;;  %v1017_v15 = vpop.permute.xlu0 %1016 }
 0x355   : > { %v943_v4 = vadd.f32 1.0, %v1641_v29  ;;  %v2187_v35 = vadd.f32 %v960_v19, %v709_v18 }
 0x356   : > { %v1643_v20 = vpop.eup %1642  ;;  %v2190_v21 = vadd.f32 %v961_v33, %v710_v32 }
 0x357   : > { %v1645_v38 = vpop.eup %1644  ;;  %1652 = vrcp.f32 %v943_v4  ;;  %v962_v28 = vmul.f32 %v1643_v20, %v872_v34 }
 0x358   : > { %v963_v31 = vmul.f32 %v1645_v38, %v874_v56  ;;  %v1027_v38 = vpop.permute.xlu0 %1026 }
 0x359   : > { %v2197_v40 = vadd.f32 %v962_v28, %v711_v46  ;;  %v1491_v41 = vpack.c.bf16 %v962_v28, %v960_v19 }
 0x35a   : > { %v1647_v22 = vpop.eup %1646  ;;  %v2200_v42 = vadd.f32 %v963_v31, %v712_v49  ;;  %v1489_v43 = vpack.c.bf16 %v963_v31, %v961_v33 }
 0x35b   : > { %v1649_v45 = vpop.eup %1648  ;;  %v964_v36 = vmul.f32 %v1647_v22, %v878_v5 }
 0x35c   : > { %1490 = vmatprep.subr.bf16.mxu1 %v1489_v43  ;;  %v965_v37 = vmul.f32 %v1649_v45, %v880_v6 }
 0x35d   : > { %1492 = vmatpush1.bf16.msra.mxu1 %v1491_v41  ;;  %v2207_v48 = vadd.f32 %v964_v36, %v713_v62  ;;  %v1032_v41 = vpop.permute.xlu1 %1031 }
 0x35e   : > { %v1651_v58 = vpop.eup %1650  ;;  %v2209_v50 = vadd.f32 %v965_v37, %v714_v63 }
 0x35f   : > { %v966_v52 = vmul.f32 %v1651_v58, %v884_v8 }
 0x361   : > { %v1653_v23 = vpop.eup %1652  ;;  %v2214_v26 = vadd.f32 %v966_v52, %v715_v25  ;;  %v1495_v7 = vpack.c.bf16 %v966_v52, %v964_v36 }
 0x362   : > { %v967_v59 = vmul.f32 %v1653_v23, %v886_v57 }
 0x364   : > { %v2218_v27 = vadd.f32 %v967_v59, %v716_v44  ;;  %v1493_v53 = vpack.c.bf16 %v967_v59, %v965_v37 }
 0x366   : > { %1494 = vmatprep.subr.bf16.mxu1 %v1493_v53 }
 0x367   : > { %1496 = vmatpush1.bf16.msra.mxu1 %v1495_v7 }
 0x36a   : > { %1442 = vmatmul.mubr.msk.f32.vlgmr.msra.gmra.mrb[16].mxu1 %vm264_vm0, %v1426_v9  ;;  %v997_v9 = vpop.permute.xlu0 %996 }
 0x36b   : > { %1128 = vmatprep.mubr.f32.mxu1 %v1766_v0 }
 0x36e   : > { %1443 = vmatmul.mubr.msk.f32.gmra.mrb[18].mxu1 %vm264_vm0, %v1427_v47 }
 0x36f   : > { %1134 = vmatprep.mubr.f32.mxu1 %v1766_v0 }
 0x372   : > { %1444 = vmatmul.mubr.msk.f32.gmra.mrb[20].mxu1 %vm264_vm0, %v1428_v11 }
 0x373   : > { %1140 = vmatprep.mubr.f32.mxu1 %v1766_v0 }
 0x376   : > { %1445 = vmatmul.mubr.msk.f32.gmra.mrb[22].mxu1 %vm264_vm0, %v1429_v51 }
 0x377   : > { %1146 = vmatprep.mubr.f32.mxu1 %v1766_v0 }
 0x37a   : > { %1446 = vmatmul.mubr.msk.f32.gmra.mrb[24].mxu1 %vm264_vm0, %v1430_v10 }
 0x37b   : > { %1152 = vmatprep.mubr.f32.mxu1 %v1766_v0 }
 0x37e   : > { %1447 = vmatmul.mubr.msk.f32.gmra.mrb[26].mxu1 %vm264_vm0, %v1431_v54 }
 0x37f   : > { %1158 = vmatprep.mubr.f32.mxu1 %v1766_v0 }
 0x382   : > { %1448 = vmatmul.mubr.msk.f32.gmra.mrb[28].mxu1 %vm264_vm0, %v1432_v55 }
 0x383   : > { %1164 = vmatprep.mubr.f32.mxu1 %v1766_v0 }
 0x386   : > { %1449 = vmatmul.mubr.msk.f32.gmra.mrb[30].mxu1 %vm264_vm0, %v1433_v1 }
 0x43d   : > { %v2259_v2 = vpop.f32.mrb[16].mxu1 }
 0x43e   : > { %v2261_v3 = vpop.f32.mrb[17].mxu1  ;;  %v1125_v11 = vadd.f32 %v2259_v2, %v997_v9 }
 0x43f   : > { %v1127_v10 = vadd.f32 %v2261_v3, %v997_v9 }
 0x441   : > { %v2263_v12 = vpop.f32.mrb[18].mxu1 }
 0x442   : > { %v2265_v13 = vpop.f32.mrb[19].mxu1 }
 0x445   : > { %v2267_v60 = vpop.f32.mrb[20].mxu1 }
 0x446   : > { %v2269_v61 = vpop.f32.mrb[21].mxu1 }
 0x449   : > { %v2271_v14 = vpop.f32.mrb[22].mxu1 }
 0x44a   : > { %v2273_v0 = vpop.f32.mrb[23].mxu1 }
 0x44d   : > { %v1148_v16 = vpop.f32.mrb[24].mxu1 }
 0x44e   : > { %v1149_v17 = vadd.f32 %v1148_v16, %v1017_v15  ;;  %v1150_v18 = vpop.f32.mrb[25].mxu1  ;;  %v1002_v16 = vpop.permute.xlu1 %1001 }
 0x44f   : > { %v1151_v19 = vadd.f32 %v1150_v18, %v1017_v15  ;;  %v1131_v18 = vadd.f32 %v2263_v12, %v1002_v16  ;;  %v1133_v2 = vadd.f32 %v2265_v13, %v1002_v16 }
 0x450   : > { %v1450_v29 = vmul.f32 -1.442695, %v1149_v17 }
 0x451   : > { %v1451_v32 = vmul.f32 -1.442695, %v1151_v19  ;;  %v1154_v33 = vpop.f32.mrb[26].mxu1 }
 0x452   : > { %1654 = vpow2.f32 %v1450_v29  ;;  %v1155_v34 = vadd.f32 %v1154_v33, %v1022_v30  ;;  %v1156_v4 = vpop.f32.mrb[27].mxu1 }
 0x453   : > { %1656 = vpow2.f32 %v1451_v32  ;;  %v1157_v20 = vadd.f32 %v1156_v4, %v1022_v30 }
 0x454   : > { %v1452_v56 = vmul.f32 -1.442695, %v1155_v34  ;;  %v1007_v34 = vpop.permute.xlu0 %1006 }
 0x455   : > { %v1453_v46 = vmul.f32 -1.442695, %v1157_v20  ;;  %v1160_v28 = vpop.f32.mrb[28].mxu1 }
 0x456   : > { %1658 = vpow2.f32 %v1452_v56  ;;  %v1161_v39 = vadd.f32 %v1160_v28, %v1027_v38  ;;  %v1162_v49 = vpop.f32.mrb[29].mxu1 }
 0x457   : > { %1660 = vpow2.f32 %v1453_v46  ;;  %v1163_v31 = vadd.f32 %v1162_v49, %v1027_v38  ;;  %v1012_v46 = vpop.permute.xlu1 %1011 }
 0x458   : > { %v1454_v5 = vmul.f32 -1.442695, %v1161_v39  ;;  %v1143_v39 = vadd.f32 %v2271_v14, %v1012_v46 }
 0x459   : > { %v1455_v22 = vmul.f32 -1.442695, %v1163_v31  ;;  %v1166_v6 = vpop.f32.mrb[30].mxu1 }
 0x45a   : > { %1662 = vpow2.f32 %v1454_v5  ;;  %v1167_v43 = vadd.f32 %v1166_v6, %v1032_v41  ;;  %v1168_v45 = vpop.f32.mrb[31].mxu1 }
 0x45b   : > { %1664 = vpow2.f32 %v1455_v22  ;;  %v1169_v62 = vadd.f32 %v1168_v45, %v1032_v41 }
 0x45c   : > { %v1655_v36 = vpop.eup %1654  ;;  %v1456_v24 = vmul.f32 -1.442695, %v1167_v43 }
 0x45d   : > { %v1657_v63 = vpop.eup %1656  ;;  %v1195_v37 = vadd.f32 1.0, %v1655_v36  ;;  %v1457_v8 = vmul.f32 -1.442695, %v1169_v62 }
 0x45e   : > { %v1196_v58 = vadd.f32 1.0, %v1657_v63  ;;  %1666 = vpow2.f32 %v1456_v24 }
 0x45f   : > { %1668 = vrcp.f32 %v1195_v37 }
 0x460   : > { %v1659_v25 = vpop.eup %1658  ;;  %1670 = vrcp.f32 %v1196_v58 }
 0x461   : > { %v1661_v52 = vpop.eup %1660  ;;  %v1197_v57 = vadd.f32 1.0, %v1659_v25  ;;  %1672 = vpow2.f32 %v1457_v8 }
 0x462   : > { %v1198_v23 = vadd.f32 1.0, %v1661_v52 }
 0x463   : > { %1674 = vrcp.f32 %v1197_v57 }
 0x464   : > { %v1663_v7 = vpop.eup %1662  ;;  %1676 = vrcp.f32 %v1198_v23 }
 0x465   : > { %v1665_v44 = vpop.eup %1664  ;;  %v1199_v59 = vadd.f32 1.0, %v1663_v7 }
 0x466   : > { %v1200_v53 = vadd.f32 1.0, %v1665_v44 }
 0x467   : > { %1678 = vrcp.f32 %v1199_v59 }
 0x468   : > { %v1667_v47 = vpop.eup %1666  ;;  %1680 = vrcp.f32 %v1200_v53 }
 0x469   : > { %v1669_v51 = vpop.eup %1668  ;;  %v1201_v54 = vadd.f32 1.0, %v1667_v47 }
 0x46a   : > { %v1671_v55 = vpop.eup %1670  ;;  %v1219_v1 = vmul.f32 %v1669_v51, %v1125_v11 }
 0x46b   : > { %v1673_v15 = vpop.eup %1672  ;;  %v1220_v17 = vmul.f32 %v1671_v55, %v1127_v10  ;;  %1682 = vrcp.f32 %v1201_v54 }
 0x46c   : > { %v1227_v19 = vadd.f32 %v1219_v1, %v2187_v35  ;;  %v1202_v29 = vadd.f32 1.0, %v1673_v15  ;;  %v1137_v35 = vadd.f32 %v2267_v60, %v1007_v34 }
 0x46d   : > { %v1675_v30 = vpop.eup %1674  ;;  %v1228_v32 = vadd.f32 %v1220_v17, %v2190_v21  ;;  %v1139_v21 = vadd.f32 %v2269_v61, %v1007_v34 }
 0x46e   : > { %v1677_v33 = vpop.eup %1676  ;;  %1235 = vst [vmem:[%s2284_s23] sm:$0xff] %v1227_v19  ;;  %v1221_v3 = vmul.f32 %v1675_v30, %v1131_v18  ;;  %1684 = vrcp.f32 %v1202_v29 }
 0x46f   : > { %1236 = vst [vmem:[%s2284_s23 + $0x8] sm:$0xff] %v1228_v32  ;;  %v1222_v12 = vmul.f32 %v1677_v33, %v1133_v2 }
 0x470   : > { %v1229_v13 = vadd.f32 %v1221_v3, %v2197_v40 }
 0x471   : > { %v1679_v4 = vpop.eup %1678  ;;  %v1230_v20 = vadd.f32 %v1222_v12, %v2200_v42  ;;  %v1145_v42 = vadd.f32 %v2273_v0, %v1012_v46 }
 0x472   : > { %v1681_v56 = vpop.eup %1680  ;;  %1237 = vst [vmem:[%s2284_s23 + $0x10] sm:$0xff] %v1229_v13  ;;  %v1223_v38 = vmul.f32 %v1679_v4, %v1137_v35 }
 0x473   : > { %1238 = vst [vmem:[%s2284_s23 + $0x18] sm:$0xff] %v1230_v20  ;;  %v1224_v28 = vmul.f32 %v1681_v56, %v1139_v21 }
 0x474   : > { %v1231_v60 = vadd.f32 %v1223_v38, %v2207_v48 }
 0x475   : > { %v1683_v40 = vpop.eup %1682  ;;  %v1232_v61 = vadd.f32 %v1224_v28, %v2209_v50 }
 0x476   : > { %1239 = vst [vmem:[%s2284_s23 + $0x20] sm:$0xff] %v1231_v60  ;;  %v1225_v49 = vmul.f32 %v1683_v40, %v1143_v39 }
 0x477   : > { %1240 = vst [vmem:[%s2284_s23 + $0x28] sm:$0xff] %v1232_v61 }
 0x478   : > { %v1685_v31 = vpop.eup %1684  ;;  %v1233_v5 = vadd.f32 %v1225_v49, %v2214_v26 }
 0x479   : > { %v1226_v41 = vmul.f32 %v1685_v31, %v1145_v42 }
 0x47a   : > { %1241 = vst [vmem:[%s2284_s23 + $0x30] sm:$0xff] %v1233_v5 }
 0x47b   : > { %v1234_v48 = vadd.f32 %v1226_v41, %v2218_v27 }
 0x47d   : > { %1242 = vst [vmem:[%s2284_s23 + $0x38] sm:$0xff] %v1234_v48 }
 0x47e   : > { %1699 = shalt.err (!%p1696_p5)
}
 0x47f   : > { %s1700_s8 = scalar_lea.hbm %s2307_s30, 1024  ;;  %s1704_s11 = scalar_lea.hbm %s2364_s3, 2048 }
 0x480   : > { %p1701_p6 = scmp.ne.s32.totalorder %s2307_s30, %s1700_s8  ;;  %p1705_p10 = scmp.lt.u32.totalorder %s2307_s30, %s2364_s3 }
 0x481   : > { %p1706_p11 = scmp.lt.u32.totalorder %s1704_s11, %s1700_s8  ;;  %p1708_p13 = scmp.lt.u32.totalorder %s1700_s8, %s2307_s30 }
 0x482   : > { %p1702_p7 = pnand %p1701_p6, %p1831_p4 }
 0x483   : > { %p1707_p12 = por %p1706_p11, %p1705_p10 }
 0x484   : > { %p1703_p9 = pneg %p1702_p7 }
 0x485   : > { %p1709_p0 = por %p1708_p13, %p1707_p12 }
 0x487   : > { %p1710_p1 = pnand %p1709_p0, %p1703_p9 }
 0x489   : > { %1713 = shalt.err (!%p1710_p1)
}
 0x48a   : > { %s1769_s21 = smov 256   ;;  %s1770_s23 = smov 16  }
 0x48b   : > { %1497 = dma.vmem_to_hbm [thread:$0]  (%p1831_p4), %s2309_s27, 1024, %s2307_s30, %s2315_s15, %s1769_s21, %s1769_s21, %s1770_s23  }
 0x48c PF: > { %p1503_p2 = scmp.ge.s32.totalorder %s1764_s17, 2  ;;  %s1274_s26 = sand.u32 1, %s1744_s12  }
 0x48d   : > { %s1275_s28 = scalar_lea.sflag [#allocation3], %s1274_s26 }
 0x48e   : > { %p1500_p3 = pnand %p1503_p2, %p1838_p8 }
 0x490   : > { %1739 = dma.done.wait (!%p1500_p3), %s1275_s28, 1024  }
 0x491   : > { %1741 = vsyncadd (!%p1500_p3), %s1275_s28, 4294966272  ;;  %s16_s17 = sadd.s32 1, %s1764_s17   ;;  %s2367_s12 = smov %s1748_s13 }
 0x492   : > { %p13_p5 = scmp.ge.s32.totalorder %s16_s17, 4   ;;  %s2368_s13 = smov %s1752_s14 }
 0x493   : > { %s2369_s14 = smov %s1844_s25  ;;  %s2370_s15 = smov %s1760_s16 }
 0x494   : > { %s2371_s16 = smov %s2373_s20  ;;  %15 = sbr.rel (!%p13_p5) target bundleno = 4 (0x4), region = 73 }
 0x49b   :  { %1280 = vsyncpa [#allocation3], 1 }
 0x49c   :  { %1282 = vsyncpa [#allocation3 + $0x1], 1 }

</bundles_post_ra>
